<compile_context>
chip_gen: v6e
topology: v6e:2x2x1
jax: 0.10.0
libtpu: 0.0.40
codegen_flags: <defaults>
</compile_context>

<pallas_src>
import functools

import jax
import jax.numpy as jnp
from jax.experimental import pallas as pl
from jax.experimental.pallas import tpu as pltpu

TEMP = 1.5  # matches `temp = 1.5` in the PyTorch script


def _round_up(x, m):
    return (x + m - 1) // m * m


def _la_loss_kernel(x_ref, logp_ref, tgt_ref, out_ref, *, temp):
    # x_ref:    (TR, C)  logits tile (any float dtype; upcast here)
    # logp_ref: (1, C)   log class prior
    # tgt_ref:  (TR, 1)  int32 targets, -1 marks padded rows
    # out_ref:  (1, 8, 128) lane-dense per-tile partial loss sum
    x = x_ref[...].astype(jnp.float32)
    lp = logp_ref[...].astype(jnp.float32)
    adj = x + temp * lp                                        # (TR, C)

    tr, c = adj.shape
    tgt = tgt_ref[...]                                         # (TR, 1) int32
    col = jax.lax.broadcasted_iota(jnp.int32, (tr, c), 1)
    is_tgt = col == tgt                                        # (TR, C) bool

    # Single pass over adj: stable LSE + fused target gather (vsel, no
    # one-hot float multiply).
    row_max = jnp.max(adj, axis=1, keepdims=True)              # (TR, 1)
    sum_exp = jnp.sum(jnp.exp(adj - row_max), axis=1, keepdims=True)
    tgt_logit = jnp.sum(jnp.where(is_tgt, adj, 0.0), axis=1, keepdims=True)
    lse = jnp.log(sum_exp) + row_max                           # (TR, 1)

    valid = (tgt >= 0).astype(jnp.float32)                     # mask padded rows
    partial = jnp.sum((lse - tgt_logit) * valid)               # scalar partial sum

    # One full, unmasked vreg store per tile; wrapper reads [:, 0, 0].
    out_ref[...] = jnp.broadcast_to(partial, out_ref.shape)


def _pick_rows_tile(n, c, itemsize, *, max_tile_bytes=2 << 20, max_rows=1024):
    """Row tile: multiple of 8, <= ~2 MiB per double-buffered input tile,
    capped at 1024 rows; small enough for v7x (64 MiB VMEM) and v5e's 16 MiB
    default scoped limit, big enough to amortize per-step overhead."""
    rows_from_vmem = max(8, (max_tile_bytes // max(1, c * itemsize)) // 8 * 8)
    return int(min(rows_from_vmem, max_rows, _round_up(n, 8)))


def la_loss(inputs, log_prob, target, *, temp=TEMP, rows_tile=None):
    """Pallas TPU implementation of LA_Loss.forward.

    inputs:   (N, C) float logits (f32 or bf16; bf16 halves HBM traffic)
    log_prob: (C,)   float log class prior
    target:   (N,)   int class indices in [0, C)
    returns scalar f32 mean cross-entropy of (inputs + temp * log_prob, target)
    """
    n, c = inputs.shape
    if rows_tile is None:
        rows_tile = _pick_rows_tile(n, c, inputs.dtype.itemsize)
    assert rows_tile % 8 == 0, "row tile must be sublane-aligned"
    n_pad = _round_up(n, rows_tile)
    num_tiles = n_pad // rows_tile

    x = inputs
    tgt = target.astype(jnp.int32)
    if n_pad != n:
        x = jnp.pad(x, ((0, n_pad - n), (0, 0)))
        tgt = jnp.pad(tgt, (0, n_pad - n), constant_values=-1)
    tgt2d = tgt.reshape(n_pad, 1)
    logp2d = log_prob.reshape(1, c)

    kernel = functools.partial(_la_loss_kernel, temp=float(temp))
    partials = pl.pallas_call(
        kernel,
        out_shape=jax.ShapeDtypeStruct((num_tiles, 8, 128), jnp.float32),
        grid_spec=pltpu.PrefetchScalarGridSpec(
            num_scalar_prefetch=0,
            grid=(num_tiles,),
            in_specs=[
                pl.BlockSpec((rows_tile, c), lambda i: (i, 0)),
                pl.BlockSpec((1, c), lambda i: (0, 0)),
                pl.BlockSpec((rows_tile, 1), lambda i: (i, 0)),
            ],
            out_specs=pl.BlockSpec((1, 8, 128), lambda i: (i, 0, 0)),
        ),
        compiler_params=pltpu.CompilerParams(
            dimension_semantics=("parallel",),
        ),
        cost_estimate=pl.CostEstimate(
            flops=5 * n_pad * c,
            transcendentals=n_pad * c,
            bytes_accessed=(n_pad * c * inputs.dtype.itemsize
                            + c * log_prob.dtype.itemsize
                            + n_pad * 4
                            + num_tiles * 8 * 128 * 4),
        ),
    )(x, logp2d, tgt2d)

    # Tiny final reduction + mean over the *true* batch size in the wrapper.
    return jnp.sum(partials[:, 0, 0]) / jnp.float32(n)


def _reference(inputs, log_prob, target, temp=TEMP):
    adj = inputs.astype(jnp.float32) + temp * log_prob.astype(jnp.float32)
    logz = jax.nn.logsumexp(adj, axis=1)
    tgt_logit = jnp.take_along_axis(adj, target[:, None], axis=1)[:, 0]
    return jnp.mean(logz - tgt_logit)


if __name__ == "__main__":
    key = jax.random.PRNGKey(0)
    k1, k2, k3, k4, k5 = jax.random.split(key, 5)

    # Primary small case: batch of 8 samples, 32 classes (single tile).
    N, C = 8, 32
    x = jax.random.normal(k1, (N, C), dtype=jnp.float32)
    prior_logits = jax.random.normal(k2, (C,), dtype=jnp.float32)
    log_prob = jax.nn.log_softmax(prior_logits)
    target = jax.random.randint(k3, (N,), 0, C, dtype=jnp.int32)

    loss = la_loss(x, log_prob, target)
    jax.block_until_ready(loss)
    ref = _reference(x, log_prob, target)
    assert jnp.allclose(loss, ref, atol=1e-5, rtol=1e-5), (loss, ref)

    # Second case: multi-tile grid + row padding/masking path
    # (N=20 with rows_tile=8 -> 3 tiles, last tile has 4 padded rows).
    N2, C2 = 20, 32
    x2 = jax.random.normal(k4, (N2, C2), dtype=jnp.float32)
    target2 = jax.random.randint(k5, (N2,), 0, C2, dtype=jnp.int32)
    loss2 = la_loss(x2, log_prob, target2, rows_tile=8)
    jax.block_until_ready(loss2)
    ref2 = _reference(x2, log_prob, target2)
    assert jnp.allclose(loss2, ref2, atol=1e-5, rtol=1e-5), (loss2, ref2)

    print("KERNEL_OK")
</pallas_src>

<mosaic_0001>
module attributes {stable_mosaic.version = 11 : i64} {
  func.func @_la_loss_kernel(%arg0: i32, %arg1: memref<8x32xf32, #tpu.memory_space<vmem>>, %arg2: memref<1x32xf32, #tpu.memory_space<vmem>>, %arg3: memref<8x1xi32, #tpu.memory_space<vmem>>, %arg4: memref<1x8x128xf32, #tpu.memory_space<vmem>>) attributes {dimension_semantics = [#tpu.dimension_semantics<parallel>], iteration_bounds = array<i64: 1>, scalar_prefetch = 0 : i64, scratch_operands = 0 : i64, tpu.core_type = #tpu.core_type<tc>, window_params = [{transform_indices = @transform_0, window_bounds = array<i64: 8, 32>}, {pipeline_mode = #tpu.pipeline_mode<synchronous>, transform_indices = @transform_1, window_bounds = array<i64: 1, 32>}, {transform_indices = @transform_2, window_bounds = array<i64: 8, 1>}, {transform_indices = @transform_3, window_bounds = array<i64: 1, 8, 128>}]} {
    %c0 = arith.constant 0 : index
    %c0_0 = arith.constant 0 : index
    %0 = vector.load %arg1[%c0, %c0_0] : memref<8x32xf32, #tpu.memory_space<vmem>>, vector<8x32xf32>
    %c0_1 = arith.constant 0 : index
    %c0_2 = arith.constant 0 : index
    %1 = vector.load %arg2[%c0_1, %c0_2] : memref<1x32xf32, #tpu.memory_space<vmem>>, vector<1x32xf32>
    %cst = arith.constant 1.500000e+00 : f32
    %2 = vector.broadcast %cst : f32 to vector<1x32xf32>
    %3 = arith.mulf %2, %1 : vector<1x32xf32>
    %4 = vector.broadcast %3 : vector<1x32xf32> to vector<8x32xf32>
    %5 = arith.addf %0, %4 : vector<8x32xf32>
    %c0_3 = arith.constant 0 : index
    %c0_4 = arith.constant 0 : index
    %6 = vector.load %arg3[%c0_3, %c0_4] : memref<8x1xi32, #tpu.memory_space<vmem>>, vector<8x1xi32>
    %7 = tpu.iota {dimensions = array<i32: 1>} : vector<8x32xi32>
    %8 = vector.broadcast %6 : vector<8x1xi32> to vector<8x32xi32>
    %9 = arith.cmpi eq, %7, %8 : vector<8x32xi32>
    %cst_5 = arith.constant dense<0xFF800000> : vector<8xf32>
    %10 = vector.multi_reduction <maximumf>, %5, %cst_5 [1] : vector<8x32xf32> to vector<8xf32>
    %11 = vector.shape_cast %10 : vector<8xf32> to vector<8x1xf32>
    %12 = vector.broadcast %11 : vector<8x1xf32> to vector<8x32xf32>
    %13 = arith.subf %5, %12 : vector<8x32xf32>
    %14 = math.exp %13 : vector<8x32xf32>
    %cst_6 = arith.constant dense<0.000000e+00> : vector<8xf32>
    %15 = vector.multi_reduction <add>, %14, %cst_6 [1] : vector<8x32xf32> to vector<8xf32>
    %16 = vector.shape_cast %15 : vector<8xf32> to vector<8x1xf32>
    %cst_7 = arith.constant 0.000000e+00 : f32
    %17 = vector.broadcast %cst_7 : f32 to vector<8x32xf32>
    %18 = arith.select %9, %5, %17 : vector<8x32xi1>, vector<8x32xf32>
    %cst_8 = arith.constant dense<0.000000e+00> : vector<8xf32>
    %19 = vector.multi_reduction <add>, %18, %cst_8 [1] : vector<8x32xf32> to vector<8xf32>
    %20 = vector.shape_cast %19 : vector<8xf32> to vector<8x1xf32>
    %21 = math.log %16 : vector<8x1xf32>
    %22 = arith.addf %21, %11 : vector<8x1xf32>
    %c0_i32 = arith.constant 0 : i32
    %23 = vector.broadcast %c0_i32 : i32 to vector<8x1xi32>
    %24 = arith.cmpi sge, %6, %23 : vector<8x1xi32>
    %25 = arith.extui %24 : vector<8x1xi1> to vector<8x1xi32>
    %26 = arith.sitofp %25 : vector<8x1xi32> to vector<8x1xf32>
    %27 = arith.subf %22, %20 : vector<8x1xf32>
    %28 = arith.mulf %27, %26 : vector<8x1xf32>
    %29 = vector.shape_cast %28 : vector<8x1xf32> to vector<1x8x1xf32>
    %cst_9 = arith.constant dense<0.000000e+00> : vector<1xf32>
    %30 = vector.multi_reduction <add>, %29, %cst_9 [1, 2] : vector<1x8x1xf32> to vector<1xf32>
    %31 = vector.shape_cast %30 : vector<1xf32> to vector<1x1x1xf32>
    %32 = vector.extract %31[0, 0, 0] : f32 from vector<1x1x1xf32>
    %33 = vector.broadcast %32 : f32 to vector<1x8x128xf32>
    %c0_10 = arith.constant 0 : index
    %c0_11 = arith.constant 0 : index
    %c0_12 = arith.constant 0 : index
    %34 = vector.load %arg4[%c0_10, %c0_11, %c0_12] : memref<1x8x128xf32, #tpu.memory_space<vmem>>, vector<1x8x128xf32>
    tpu.vector_store %arg4[%c0_10, %c0_11, %c0_12], %33 {strides = array<i32>} : memref<1x8x128xf32, #tpu.memory_space<vmem>>, vector<1x8x128xf32>,
    return
  }
  func.func @transform_0(%arg0: i32) -> (i32, i32) {
    %c0_i32 = arith.constant 0 : i32
    %c0_i32_0 = arith.constant 0 : i32
    return %arg0, %c0_i32 : i32, i32
  }
  func.func @transform_1(%arg0: i32) -> (i32, i32) {
    %c0_i32 = arith.constant 0 : i32
    %c0_i32_0 = arith.constant 0 : i32
    %c0_i32_1 = arith.constant 0 : i32
    return %c0_i32, %c0_i32_0 : i32, i32
  }
  func.func @transform_2(%arg0: i32) -> (i32, i32) {
    %c0_i32 = arith.constant 0 : i32
    %c0_i32_0 = arith.constant 0 : i32
    return %arg0, %c0_i32 : i32, i32
  }
  func.func @transform_3(%arg0: i32) -> (i32, i32, i32) {
    %c0_i32 = arith.constant 0 : i32
    %c0_i32_0 = arith.constant 0 : i32
    %c0_i32_1 = arith.constant 0 : i32
    return %arg0, %c0_i32, %c0_i32_0 : i32, i32, i32
  }
}

</mosaic_0001>

<bundles_post_ra>
// kernel: tpu_custom_call.1
= control target key start
LH: loop header
LB: loop body
LE: loop exit
PB: predicated region body
PF: predicated region fallthrough
CT: control target
= control target key end

     0   :  { %v19_v1 = vlaneseq  ;;  %v114_v2 = vmov 0   ;;  %s152_s0 = inlined_call_operand.vmem [shape: f32[8,32], index: 0, kind: input, shape index: {}]   ;;  %s153_s1 = inlined_call_operand.vmem [shape: f32[1,32], index: 1, kind: input, shape index: {}]   ;;  %s154_s2 = inlined_call_operand.vmem [shape: s32[8,1], index: 2, kind: input, shape index: {}]   ;;  %s155_s3 = inlined_call_operand.hbm [shape: f32[1,8,128], index: 3, kind: output, shape index: {}]  }
   0x1   :  { %v16_v0 = vld [vmem:[%s153_s1] sm:$0x1]  ;;  %87 = vset.pattern.permute.xlu0 %v114_v2 }
   0x2   :  { %8 = vsyncpa [#allocation3], 0  ;;  %v17_v3 = vmul.f32 1.5, %v16_v0  ;;  %v20_v4 = vshrl.u32 %v19_v1, 7  ;;  %v15_v6 = vld [vmem:[%s152_s0] sm:$0xff]  ;;  %vm32_vm0 = vcmask 261120  }
   0x3   :  { %v25_v10 = vld [vmem:[%s154_s2] sm:$0xff]  ;;  %v27_v14 = vand.u32 127, %v19_v1  ;;  %v115_v25 = vmov 0.0   ;;  %vm54_vm3 = vcmask 7168   ;;  %s116_s0 = smov [#allocation2]  }
   0x4   :  { %v21_v5 = vsub.s32 0, %v20_v4  ;;  %vm49_vm2 = vcmp.ge.s32.totalorder %v25_v10, 0  ;;  %s73_s1 = sshll.u32 %s116_s0, 4  ;;  %s74_s1 = int_to_ptr.vmem [resolvable:$true] %s73_s1 }
   0x5   :  { %v81_v26 = vsel %vm49_vm2, 1.0, %v115_v25  ;;  %s92_s18 = scalar_lea.vmem %s74_s1, 128  ;;  %p97_p1 = scmp.lt.s32.totalorder %s74_s1, %s74_s1 }
   0x6   :  { %v22_v7 = vrot.slane %v17_v3, %v21_v5  ;;  %p93_p0 = scmp.ne.s32.totalorder %s74_s1, %s92_s18  ;;  %p98_p2 = scmp.lt.s32.totalorder %s92_s18, %s92_s18 }
   0x8   :  { %v24_v8 = vadd.f32 %v22_v7, %v15_v6  ;;  %p99_p3 = por %p98_p2, %p97_p1 }
   0xa   :  { %v33_v9 = vsel %vm32_vm0, %v24_v8, -inf  ;;  %p100_p4 = pnand %p99_p3, %p93_p0 }
   0xb   :  { %34 = vmax.xlane.f32.xlu0 %v33_v9 }
  0x21   :  { %29 = vperm.xlu0 %87, %v25_v10  }
  0x94   :  { %v35_v11 = vpop.xlane.xlu0 %34 }
  0x95   :  { %v36_v12 = vsub.f32 %v24_v8, %v35_v11 }
  0x97   :  { %v37_v13 = vmul.f32 1.442695, %v36_v12 }
  0x99   :  { %88 = vpow2.f32 %v37_v13 }
  0x9c   :  { %v30_v15 = vpop.permute.xlu0 %29 }
  0x9d   :  { %vm31_vm1 = vcmp.eq.s32.totalorder %v27_v14, %v30_v15 }
  0x9e   :  { %v42_v17 = vsel %vm31_vm1, %v24_v8, 0.0 }
  0x9f   :  { %v43_v19 = vsel %vm32_vm0, %v42_v17, 0.0 }
  0xa6   :  { %v89_v16 = vpop.eup %88 }
  0xa7   :  { %v39_v18 = vsel %vm32_vm0, %v89_v16, 0.0 }
  0xa8   :  { %40 = vadd.xlane.f32.xlu1 %v39_v18 }
  0xac   :  { %44 = vadd.xlane.f32.xlu1 %v43_v19 }
 0x131   :  { %v41_v20 = vpop.xlane.xlu1 %40 }
 0x132   :  { %90 = vlog2.f32 %v41_v20 }
 0x135   :  { %v45_v23 = vpop.xlane.xlu1 %44 }
 0x13f   :  { %v91_v21 = vpop.eup %90 }
 0x140   :  { %v47_v22 = vmul.f32 0.6931472, %v91_v21 }
 0x142   :  { %v48_v24 = vadd.f32 %v47_v22, %v35_v11 }
 0x144   :  { %v52_v27 = vsub.f32 %v48_v24, %v45_v23 }
 0x146   :  { %v53_v28 = vmul.f32 %v81_v26, %v52_v27 }
 0x148   :  { %v55_v29 = vsel %vm54_vm3, %v53_v28, 0.0 }
 0x149   :  { %56 = vadd.xlane.f32.xlu1 %v55_v29 }
 0x1d2   :  { %v57_v30 = vpop.xlane.xlu1 %56 }
 0x1d3   :  { %v58_v31 = vrot.slane %v57_v30, 4 }
 0x1d5   :  { %v59_v32 = vadd.f32 %v58_v31, %v57_v30 }
 0x1d7   :  { %v60_v33 = vrot.slane %v59_v32, 2 }
 0x1d9   :  { %v61_v34 = vadd.f32 %v60_v33, %v59_v32 }
 0x1db   :  { %v62_v35 = vrot.slane %v61_v34, 1 }
 0x1dd   :  { %v63_v36 = vadd.f32 %v62_v35, %v61_v34 }
 0x1df   :  { %82 = vpush %v63_v36 }
 0x210   :  { %s83_s2 = spop %82 }
 0x211   :  { %v65_v37 = vstv %s83_s2 }
 0x212   :  { %66 = vst [vmem:[#allocation2] sm:$0xff] %v65_v37 }
 0x213   :  { %103 = shalt.err (!%p100_p4)
}
 0x214   :  { %76 = dma.vmem_to_hbm [thread:$0]  %s74_s1, 128, %s155_s3, [#allocation3]  }
 0x215   :  { %112 = dma.done.wait [#allocation3], 128  }
 0x216   :  { %113 = vsyncadd [#allocation3], 4294967168 }
 0x217   :  { %80 = vsyncpa [#allocation3], 1 }

</bundles_post_ra>
